<compile_context>
chip_gen: v5e
topology: v5e:2x2
jax: 0.10.0
libtpu: 0.0.40
codegen_flags: <defaults>
</compile_context>

<pallas_src>
import jax
import jax.numpy as jnp
from jax.experimental import pallas as pl
from jax.experimental.pallas import tpu as pltpu


def generator_kernel(z_ref, w1_ref, b1_ref, w2_ref, b2_ref, w3_ref, b3_ref, o_ref):
    # fc1 + leaky_relu(negative_slope=0.2); accumulate in f32 on the MXU.
    h1 = jnp.dot(z_ref[...], w1_ref[...], preferred_element_type=jnp.float32)
    h1 = h1 + b1_ref[...]
    h1 = jnp.maximum(h1, 0.2 * h1)            # leaky_relu, slope 0.2 (1 vmul + 1 vmax)

    # fc2 + tanh (cast back to weight dtype so bf16 operands hit the bf16 MXU path;
    # tanh itself runs in f32 on the EUP).
    h2 = jnp.dot(h1.astype(w2_ref.dtype), w2_ref[...],
                 preferred_element_type=jnp.float32)
    h2 = jnp.tanh(h2 + b2_ref[...])

    # fc3 + relu; store the logical (block_b, O) tile directly (no lane padding).
    h3 = jnp.dot(h2.astype(w3_ref.dtype), w3_ref[...],
                 preferred_element_type=jnp.float32)
    h3 = h3 + b3_ref[...]
    o_ref[...] = jnp.maximum(h3, 0.0).astype(o_ref.dtype)


def generator_forward(z, w1, b1, w2, b2, w3, b3, *,
                      block_b=256, compute_dtype=None, out_dtype=None):
    """z: (B, Z). Weights pre-transposed to (in, out); biases (1, out).

    compute_dtype: optionally jnp.bfloat16 to feed bf16 operands to the MXU
      (a win on v5e, v6e and v7x alike); accumulation and all elementwise /
      transcendental math stay f32.
    out_dtype: optionally bfloat16 to halve the dominant output HBM stream if
      the consumer tolerates it. Defaults to z's dtype.
    """
    B, Z = z.shape
    H = w1.shape[1]
    O = w3.shape[1]
    if out_dtype is None:
        out_dtype = z.dtype

    # --- Optional bf16 MXU operands (biases stay f32 for f32 elementwise math).
    if compute_dtype is not None:
        z = z.astype(compute_dtype)
        w1 = w1.astype(compute_dtype)
        w2 = w2.astype(compute_dtype)
        w3 = w3.astype(compute_dtype)
    b1 = b1.astype(jnp.float32)
    b2 = b2.astype(jnp.float32)
    b3 = b3.astype(jnp.float32)

    # --- Batch tile: keep 2-4 grid steps so the output writeback pipelines
    # with compute (and >=2 steps per TC when v7x splits the parallel axis).
    # Align to 16 rows for sub-32-bit operands (full sublane packing), else 8.
    align = 16 if jnp.dtype(z.dtype).itemsize < 4 else 8
    block_b = min(block_b, B)
    if block_b < B:
        block_b = max(align, (block_b // align) * align)

    grid = (pl.cdiv(B, block_b),)

    # --- Advisory cost estimate for the XLA scheduler (unpadded, honest).
    elem_in = jnp.dtype(z.dtype).itemsize
    flops = 2 * B * (Z * H + H * H + H * O)
    bytes_accessed = (
        B * Z * elem_in                                  # z
        + B * O * jnp.dtype(out_dtype).itemsize          # output
        + (Z * H + H * H + H * O) * elem_in              # weights
        + (2 * H + O) * 4                                # f32 biases
    )
    cost = pl.CostEstimate(flops=flops, transcendentals=B * H,
                           bytes_accessed=bytes_accessed)

    return pl.pallas_call(
        generator_kernel,
        out_shape=jax.ShapeDtypeStruct((B, O), out_dtype),
        grid=grid,
        in_specs=[
            pl.BlockSpec((block_b, Z), lambda i: (i, 0)),    # z tile (batch-tiled)
            pl.BlockSpec((Z, H), lambda i: (0, 0)),          # W1 (resident)
            pl.BlockSpec((1, H), lambda i: (0, 0)),          # b1
            pl.BlockSpec((H, H), lambda i: (0, 0)),          # W2
            pl.BlockSpec((1, H), lambda i: (0, 0)),          # b2
            pl.BlockSpec((H, O), lambda i: (0, 0)),          # W3
            pl.BlockSpec((1, O), lambda i: (0, 0)),          # b3
        ],
        out_specs=pl.BlockSpec((block_b, O), lambda i: (i, 0)),
        compiler_params=pltpu.CompilerParams(
            dimension_semantics=("parallel",)),
        cost_estimate=cost,
    )(z, w1, b1, w2, b2, w3, b3)


def reference_forward(z, w1, b1, w2, b2, w3, b3):
    h1 = z @ w1 + b1
    h1 = jnp.where(h1 > 0, h1, 0.2 * h1)
    h2 = jnp.tanh(h1 @ w2 + b2)
    return jnp.maximum(h2 @ w3 + b3, 0.0)


if __name__ == "__main__":
    # Shapes implied by the module: z_size=16, hidden_size=32, output_size=64.
    # Small batch; block_b=128 gives a 2-step parallel grid so the output
    # writeback of step 0 overlaps compute of step 1.
    B, Z, H, O = 256, 16, 32, 64
    key = jax.random.PRNGKey(0)
    kz, k1, k2, k3, kb1, kb2, kb3 = jax.random.split(key, 7)

    z = jax.random.normal(kz, (B, Z), dtype=jnp.float32)

    # Deterministic parameter init (uniform, like PyTorch Linear default scale).
    def lin_init(kw, kb, fan_in, fan_out):
        bound = 1.0 / jnp.sqrt(fan_in)
        w = jax.random.uniform(kw, (fan_in, fan_out), jnp.float32, -bound, bound)
        b = jax.random.uniform(kb, (1, fan_out), jnp.float32, -bound, bound)
        return w, b

    w1, b1 = lin_init(k1, kb1, Z, H)
    w2, b2 = lin_init(k2, kb2, H, H)
    w3, b3 = lin_init(k3, kb3, H, O)

    ref = reference_forward(z, w1, b1, w2, b2, w3, b3)

    # f32 path: strict check.
    out = generator_forward(z, w1, b1, w2, b2, w3, b3, block_b=128)
    out = jax.block_until_ready(out)
    assert out.shape == (B, O)
    assert out.dtype == jnp.float32
    assert jnp.allclose(out, ref, atol=1e-5, rtol=1e-5)

    # bf16 MXU-operand path (recommended on all generations): loose check.
    out_bf16 = generator_forward(z, w1, b1, w2, b2, w3, b3, block_b=128,
                                 compute_dtype=jnp.bfloat16)
    out_bf16 = jax.block_until_ready(out_bf16)
    assert out_bf16.shape == (B, O)
    assert out_bf16.dtype == jnp.float32       # out_dtype defaults to z's dtype
    assert jnp.all(jnp.isfinite(out_bf16))
    assert jnp.allclose(out_bf16, ref, atol=1e-1, rtol=1e-1)

    print("KERNEL_OK")
</pallas_src>

<mosaic_0001>
module attributes {stable_mosaic.version = 11 : i64} {
  func.func @generator_kernel(%arg0: i32, %arg1: memref<128x16xf32, #tpu.memory_space<vmem>>, %arg2: memref<16x32xf32, #tpu.memory_space<vmem>>, %arg3: memref<1x32xf32, #tpu.memory_space<vmem>>, %arg4: memref<32x32xf32, #tpu.memory_space<vmem>>, %arg5: memref<1x32xf32, #tpu.memory_space<vmem>>, %arg6: memref<32x64xf32, #tpu.memory_space<vmem>>, %arg7: memref<1x64xf32, #tpu.memory_space<vmem>>, %arg8: memref<128x64xf32, #tpu.memory_space<vmem>>) attributes {dimension_semantics = [#tpu.dimension_semantics<parallel>], iteration_bounds = array<i64: 2>, scalar_prefetch = 0 : i64, scratch_operands = 0 : i64, tpu.core_type = #tpu.core_type<tc>, window_params = [{transform_indices = @transform_0, window_bounds = array<i64: 128, 16>}, {pipeline_mode = #tpu.pipeline_mode<synchronous>, transform_indices = @transform_1, window_bounds = array<i64: 16, 32>}, {pipeline_mode = #tpu.pipeline_mode<synchronous>, transform_indices = @transform_2, window_bounds = array<i64: 1, 32>}, {pipeline_mode = #tpu.pipeline_mode<synchronous>, transform_indices = @transform_3, window_bounds = array<i64: 32, 32>}, {pipeline_mode = #tpu.pipeline_mode<synchronous>, transform_indices = @transform_4, window_bounds = array<i64: 1, 32>}, {pipeline_mode = #tpu.pipeline_mode<synchronous>, transform_indices = @transform_5, window_bounds = array<i64: 32, 64>}, {pipeline_mode = #tpu.pipeline_mode<synchronous>, transform_indices = @transform_6, window_bounds = array<i64: 1, 64>}, {transform_indices = @transform_7, window_bounds = array<i64: 128, 64>}]} {
    %c0 = arith.constant 0 : index
    %c0_0 = arith.constant 0 : index
    %0 = vector.load %arg1[%c0, %c0_0] : memref<128x16xf32, #tpu.memory_space<vmem>>, vector<128x16xf32>
    %c0_1 = arith.constant 0 : index
    %c0_2 = arith.constant 0 : index
    %1 = vector.load %arg2[%c0_1, %c0_2] : memref<16x32xf32, #tpu.memory_space<vmem>>, vector<16x32xf32>
    %cst = arith.constant dense<0.000000e+00> : vector<128x32xf32>
    %2 = tpu.matmul %0, %1, %cst {dimension_numbers = #tpu.dot_dimension_numbers<[1], [0], [0], [1], [0, 0, 1, 1], [], []>} : vector<128x16xf32>, vector<16x32xf32>, vector<128x32xf32> -> vector<128x32xf32>
    %c0_3 = arith.constant 0 : index
    %c0_4 = arith.constant 0 : index
    %3 = vector.load %arg3[%c0_3, %c0_4] : memref<1x32xf32, #tpu.memory_space<vmem>>, vector<1x32xf32>
    %4 = vector.broadcast %3 : vector<1x32xf32> to vector<128x32xf32>
    %5 = arith.addf %2, %4 : vector<128x32xf32>
    %cst_5 = arith.constant 2.000000e-01 : f32
    %6 = vector.broadcast %cst_5 : f32 to vector<128x32xf32>
    %7 = arith.mulf %6, %5 : vector<128x32xf32>
    %8 = arith.maximumf %5, %7 : vector<128x32xf32>
    %c0_6 = arith.constant 0 : index
    %c0_7 = arith.constant 0 : index
    %9 = vector.load %arg4[%c0_6, %c0_7] : memref<32x32xf32, #tpu.memory_space<vmem>>, vector<32x32xf32>
    %cst_8 = arith.constant dense<0.000000e+00> : vector<128x32xf32>
    %10 = tpu.matmul %8, %9, %cst_8 {dimension_numbers = #tpu.dot_dimension_numbers<[1], [0], [0], [1], [0, 0, 1, 1], [], []>} : vector<128x32xf32>, vector<32x32xf32>, vector<128x32xf32> -> vector<128x32xf32>
    %c0_9 = arith.constant 0 : index
    %c0_10 = arith.constant 0 : index
    %11 = vector.load %arg5[%c0_9, %c0_10] : memref<1x32xf32, #tpu.memory_space<vmem>>, vector<1x32xf32>
    %12 = vector.broadcast %11 : vector<1x32xf32> to vector<128x32xf32>
    %13 = arith.addf %10, %12 : vector<128x32xf32>
    %14 = math.tanh %13 : vector<128x32xf32>
    %c0_11 = arith.constant 0 : index
    %c0_12 = arith.constant 0 : index
    %15 = vector.load %arg6[%c0_11, %c0_12] : memref<32x64xf32, #tpu.memory_space<vmem>>, vector<32x64xf32>
    %cst_13 = arith.constant dense<0.000000e+00> : vector<128x64xf32>
    %16 = tpu.matmul %14, %15, %cst_13 {dimension_numbers = #tpu.dot_dimension_numbers<[1], [0], [0], [1], [0, 0, 1, 1], [], []>} : vector<128x32xf32>, vector<32x64xf32>, vector<128x64xf32> -> vector<128x64xf32>
    %c0_14 = arith.constant 0 : index
    %c0_15 = arith.constant 0 : index
    %17 = vector.load %arg7[%c0_14, %c0_15] : memref<1x64xf32, #tpu.memory_space<vmem>>, vector<1x64xf32>
    %18 = vector.broadcast %17 : vector<1x64xf32> to vector<128x64xf32>
    %19 = arith.addf %16, %18 : vector<128x64xf32>
    %cst_16 = arith.constant 0.000000e+00 : f32
    %20 = vector.broadcast %cst_16 : f32 to vector<128x64xf32>
    %21 = arith.maximumf %19, %20 : vector<128x64xf32>
    %c0_17 = arith.constant 0 : index
    %c0_18 = arith.constant 0 : index
    %22 = vector.load %arg8[%c0_17, %c0_18] : memref<128x64xf32, #tpu.memory_space<vmem>>, vector<128x64xf32>
    tpu.vector_store %arg8[%c0_17, %c0_18], %21 {strides = array<i32>} : memref<128x64xf32, #tpu.memory_space<vmem>>, vector<128x64xf32>,
    return
  }
  func.func @transform_0(%arg0: i32) -> (i32, i32) {
    %c0_i32 = arith.constant 0 : i32
    %c0_i32_0 = arith.constant 0 : i32
    return %arg0, %c0_i32 : i32, i32
  }
  func.func @transform_1(%arg0: i32) -> (i32, i32) {
    %c0_i32 = arith.constant 0 : i32
    %c0_i32_0 = arith.constant 0 : i32
    %c0_i32_1 = arith.constant 0 : i32
    return %c0_i32, %c0_i32_0 : i32, i32
  }
  func.func @transform_2(%arg0: i32) -> (i32, i32) {
    %c0_i32 = arith.constant 0 : i32
    %c0_i32_0 = arith.constant 0 : i32
    %c0_i32_1 = arith.constant 0 : i32
    return %c0_i32, %c0_i32_0 : i32, i32
  }
  func.func @transform_3(%arg0: i32) -> (i32, i32) {
    %c0_i32 = arith.constant 0 : i32
    %c0_i32_0 = arith.constant 0 : i32
    %c0_i32_1 = arith.constant 0 : i32
    return %c0_i32, %c0_i32_0 : i32, i32
  }
  func.func @transform_4(%arg0: i32) -> (i32, i32) {
    %c0_i32 = arith.constant 0 : i32
    %c0_i32_0 = arith.constant 0 : i32
    %c0_i32_1 = arith.constant 0 : i32
    return %c0_i32, %c0_i32_0 : i32, i32
  }
  func.func @transform_5(%arg0: i32) -> (i32, i32) {
    %c0_i32 = arith.constant 0 : i32
    %c0_i32_0 = arith.constant 0 : i32
    %c0_i32_1 = arith.constant 0 : i32
    return %c0_i32, %c0_i32_0 : i32, i32
  }
  func.func @transform_6(%arg0: i32) -> (i32, i32) {
    %c0_i32 = arith.constant 0 : i32
    %c0_i32_0 = arith.constant 0 : i32
    %c0_i32_1 = arith.constant 0 : i32
    return %c0_i32, %c0_i32_0 : i32, i32
  }
  func.func @transform_7(%arg0: i32) -> (i32, i32) {
    %c0_i32 = arith.constant 0 : i32
    %c0_i32_0 = arith.constant 0 : i32
    return %arg0, %c0_i32 : i32, i32
  }
}

</mosaic_0001>

<bundles_post_ra>
// kernel: tpu_custom_call.1
= control target key start
LH: loop header
LB: loop body
LE: loop exit
PB: predicated region body
PF: predicated region fallthrough
CT: control target
= control target key end

     0   :  { %s958_s24 = smov 0   ;;  %s1175_s0 = inlined_call_operand.vmem [shape: f32[256,16], index: 0, kind: input, shape index: {}]   ;;  %s1176_s1 = inlined_call_operand.vmem [shape: f32[16,32], index: 1, kind: input, shape index: {}]   ;;  %s1177_s2 = inlined_call_operand.vmem [shape: f32[1,32], index: 2, kind: input, shape index: {}]   ;;  %s1178_s3 = inlined_call_operand.vmem [shape: f32[32,32], index: 3, kind: input, shape index: {}]   ;;  %s1179_s4 = inlined_call_operand.vmem [shape: f32[1,32], index: 4, kind: input, shape index: {}]   ;;  %s1180_s5 = inlined_call_operand.vmem [shape: f32[32,64], index: 5, kind: input, shape index: {}]   ;;  %s1181_s6 = inlined_call_operand.vmem [shape: f32[1,64], index: 6, kind: input, shape index: {}]   ;;  %s1182_s7 = inlined_call_operand.vmem [shape: f32[256,64], index: 7, kind: output, shape index: {}]  }
   0x1 LB: > { %s798_s25 = sadd.s32 4294967295, %s916_s24   ;;  %p802_p0 = scmp.ge.s32.totalorder %s916_s24, 1  ;;  %s916_s24 = sphi %s958_s24, %s17_s24  }
   0x2   : > { %p238_p1 = scmp.lt.s32.totalorder %s916_s24, 3 }
   0x4   : > { %p239_p2 = pnand %p802_p0, %p238_p1 }
   0x5   : > { %s803_s30 = sshll.u32 (!%p239_p2), %s798_s25, 4 }
   0x6   : > { %242 = sbr.rel (%p239_p2) target bundleno = 545 (0x221), region = 48  ;;  %p271_p3 = scmp.lt.s32.totalorder (!%p239_p2), %s803_s30, 31 }
   0xb   : > { %v299_v0 = vld [vmem:[%s1176_s1 + $0x8] sm:$0xff]  ;;  %v298_v1 = vld [vmem:[%s1176_s1] sm:$0xff]  ;;  %s1184_s30 = smov (!%p271_p3, %s803_s30), 31  ;;  %vm304_vm0 = vcmask 130048   ;;  %v453_v17 = vld [vmem:[%s1178_s3 + $0x18] sm:$0xff]  ;;  %vm458_vm1 = vcmask 261120  }
   0xc   : > { %367 = vmatpush.msra.mxu0 %v299_v0  ;;  %857 = vmatpush.msra.mxu3 %v299_v0  ;;  %s804_s8 = sshll.u32 %s1184_s30, 3  ;;  %v452_v19 = vld [vmem:[%s1178_s3 + $0x10] sm:$0xff]  ;;  %v451_v20 = vld [vmem:[%s1178_s3 + $0x8] sm:$0xff]  ;;  %v450_v21 = vld [vmem:[%s1178_s3] sm:$0xff]  ;;  %vm725_vm2 = vcmask 523264  }
   0xd   : > { %s980_s11 = scalar_lea.vmem %s1175_s0, %s804_s8  ;;  %519 = vmatpush.msra.mxu1 %v453_v17  ;;  %v1029_v22 = vld [vmem:[%s1177_s2] ss:$0 sm:$0xff]  ;;  %s1123_s16 = scalar_lea.vmem %s1182_s7, %s804_s8 }
   0xe   : > { %368 = vmatpush.msra.mxu0 %v298_v1  ;;  %858 = vmatpush.msra.mxu3 %v298_v1  ;;  %v282_v2 = vld [vmem:[%s980_s11] sm:$0xff]  ;;  %v283_v3 = vld [vmem:[%s980_s11 + $0x8] sm:$0xff]  ;;  %v284_v4 = vld [vmem:[%s980_s11 + $0x10] sm:$0xff] }
   0xf   : > { %807 = vmatmul.msk.f32.vlgmr.msra.gmra.mxu0 %vm304_vm0, %v282_v2  ;;  %v285_v5 = vld [vmem:[%s980_s11 + $0x18] sm:$0xff]  ;;  %v286_v6 = vld [vmem:[%s980_s11 + $0x20] sm:$0xff]  ;;  %v287_v7 = vld [vmem:[%s980_s11 + $0x28] sm:$0xff]  ;;  %520 = vmatpush.msra.mxu1 %v452_v19 }
  0x10   : > { %v288_v8 = vld [vmem:[%s980_s11 + $0x30] sm:$0xff]  ;;  %v289_v9 = vld [vmem:[%s980_s11 + $0x38] sm:$0xff]  ;;  %v290_v10 = vld [vmem:[%s980_s11 + $0x40] sm:$0xff]  ;;  %859 = vmatpush.msrb.mxu3 %v453_v17 }
  0x11   : > { %v295_v11 = vld [vmem:[%s980_s11 + $0x68] sm:$0xff]  ;;  %v296_v13 = vld [vmem:[%s980_s11 + $0x70] sm:$0xff]  ;;  %v297_v15 = vld [vmem:[%s980_s11 + $0x78] sm:$0xff]  ;;  %521 = vmatpush.msra.mxu1 %v451_v20 }
  0x12   : > { %820 = vmatmul.msk.f32.vlgmr.msra.gmra.mxu3 %vm304_vm0, %v295_v11  ;;  %v291_v12 = vld [vmem:[%s980_s11 + $0x48] sm:$0xff]  ;;  %v292_v14 = vld [vmem:[%s980_s11 + $0x50] sm:$0xff]  ;;  %v293_v16 = vld [vmem:[%s980_s11 + $0x58] sm:$0xff] }
  0x13   : > { %v294_v18 = vld [vmem:[%s980_s11 + $0x60] sm:$0xff]  ;;  %860 = vmatpush.msrb.mxu3 %v452_v19  ;;  %522 = vmatpush.msra.mxu1 %v450_v21 }
  0x15   : > { %861 = vmatpush.msrb.mxu3 %v451_v20 }
  0x17   : > { %808 = vmatmul.msk.f32.gmra.mxu0 %vm304_vm0, %v283_v3  ;;  %862 = vmatpush.msrb.mxu3 %v450_v21 }
  0x1a   : > { %821 = vmatmul.msk.f32.gmra.mxu3 %vm304_vm0, %v296_v13  ;;  %v591_v13 = vld [vmem:[%s1180_s5 + $0x18] sm:$0xff] }
  0x1b   : > { %656 = vmatpush.msra.mxu2 %v591_v13  ;;  %863 = vmatpush.msra.mxu3 %v591_v13 }
  0x1f   : > { %809 = vmatmul.msk.f32.gmra.mxu0 %vm304_vm0, %v284_v4 }
  0x22   : > { %822 = vmatmul.msk.f32.gmra.mxu3 %vm304_vm0, %v297_v15 }
  0x27   : > { %810 = vmatmul.msk.f32.gmra.mxu0 %vm304_vm0, %v285_v5 }
  0x2f   : > { %811 = vmatmul.msk.f32.gmra.mxu0 %vm304_vm0, %v286_v6 }
  0x37   : > { %812 = vmatmul.msk.f32.gmra.mxu0 %vm304_vm0, %v287_v7 }
  0x3f   : > { %813 = vmatmul.msk.f32.gmra.mxu0 %vm304_vm0, %v288_v8 }
  0x47   : > { %814 = vmatmul.msk.f32.gmra.mxu0 %vm304_vm0, %v289_v9 }
  0x4f   : > { %815 = vmatmul.msk.f32.gmra.mxu0 %vm304_vm0, %v290_v10 }
  0x57   : > { %816 = vmatmul.msk.f32.gmra.mxu0 %vm304_vm0, %v291_v12 }
  0x5f   : > { %817 = vmatmul.msk.f32.gmra.mxu0 %vm304_vm0, %v292_v14  ;;  %v590_v14 = vld [vmem:[%s1180_s5 + $0x10] sm:$0xff] }
  0x60   : > { %657 = vmatpush.msra.mxu2 %v590_v14  ;;  %864 = vmatpush.msra.mxu3 %v590_v14 }
  0x67   : > { %818 = vmatmul.msk.f32.gmra.mxu0 %vm304_vm0, %v293_v16  ;;  %v589_v16 = vld [vmem:[%s1180_s5 + $0x8] sm:$0xff] }
  0x68   : > { %658 = vmatpush.msra.mxu2 %v589_v16  ;;  %865 = vmatpush.msra.mxu3 %v589_v16 }
  0x6f   : > { %819 = vmatmul.msk.f32.gmra.mxu0 %vm304_vm0, %v294_v18  ;;  %v588_v18 = vld [vmem:[%s1180_s5] sm:$0xff] }
  0x70   : > { %659 = vmatpush.msra.mxu2 %v588_v18  ;;  %866 = vmatpush.msra.mxu3 %v588_v18 }
  0x8c   : > { %v370_v23 = vpop.f32.mrf.mxu0 }
  0x8d   : > { %v371_v24 = vadd.f32 %v1029_v22, %v370_v23 }
  0x8f   : > { %v418_v25 = vmul.f32 0.2, %v371_v24 }
  0x91   : > { %v434_v26 = vmax.f32 %v371_v24, %v418_v25 }
  0x93   : > { %823 = vmatmul.msk.f32.vlgmr.msra.gmra.mxu1 %vm458_vm1, %v434_v26 }
  0x94   : > { %v373_v27 = vpop.f32.mrf.mxu0 }
  0x95   : > { %v374_v28 = vadd.f32 %v1029_v22, %v373_v27  ;;  %v409_v7 = vpop.f32.mrf.mxu3 }
  0x96   : > { %v410_v12 = vadd.f32 %v1029_v22, %v409_v7 }
  0x97   : > { %v419_v29 = vmul.f32 0.2, %v374_v28 }
  0x98   : > { %v431_v17 = vmul.f32 0.2, %v410_v12 }
  0x99   : > { %v435_v30 = vmax.f32 %v374_v28, %v419_v29  ;;  %v1078_v28 = vld [vmem:[%s1179_s4] ss:$0 sm:$0xff] }
  0x9a   : > { %v447_v19 = vmax.f32 %v410_v12, %v431_v17  ;;  %v1115_v12 = vld [vmem:[%s1181_s6] ss:$0 sm:$0xff] }
  0x9b   : > { %824 = vmatmul.msk.f32.gmra.mxu1 %vm458_vm1, %v435_v30 }
  0x9c   : > { %v376_v31 = vpop.f32.mrf.mxu0 }
  0x9d   : > { %v377_v32 = vadd.f32 %v1029_v22, %v376_v31  ;;  %v412_v15 = vpop.f32.mrf.mxu3 }
  0x9e   : > { %v413_v20 = vadd.f32 %v1029_v22, %v412_v15 }
  0x9f   : > { %v420_v33 = vmul.f32 0.2, %v377_v32 }
  0xa0   : > { %v432_v21 = vmul.f32 0.2, %v413_v20 }
  0xa1   : > { %v436_v34 = vmax.f32 %v377_v32, %v420_v33 }
  0xa2   : > { %v448_v24 = vmax.f32 %v413_v20, %v432_v21 }
  0xa3   : > { %825 = vmatmul.msk.f32.gmra.mxu1 %vm458_vm1, %v436_v34 }
  0xa4   : > { %v379_v35 = vpop.f32.mrf.mxu0 }
  0xa5   : > { %v380_v36 = vadd.f32 %v1029_v22, %v379_v35  ;;  %v415_v23 = vpop.f32.mrf.mxu3 }
  0xa6   : > { %v416_v25 = vadd.f32 %v1029_v22, %v415_v23 }
  0xa7   : > { %v421_v37 = vmul.f32 0.2, %v380_v36 }
  0xa8   : > { %v433_v26 = vmul.f32 0.2, %v416_v25 }
  0xa9   : > { %v437_v38 = vmax.f32 %v380_v36, %v421_v37 }
  0xaa   : > { %v449_v27 = vmax.f32 %v416_v25, %v433_v26 }
  0xab   : > { %826 = vmatmul.msk.f32.gmra.mxu1 %vm458_vm1, %v437_v38 }
  0xac   : > { %v382_v39 = vpop.f32.mrf.mxu0 }
  0xad   : > { %v383_v40 = vadd.f32 %v1029_v22, %v382_v39 }
  0xaf   : > { %v422_v41 = vmul.f32 0.2, %v383_v40 }
  0xb1   : > { %v438_v42 = vmax.f32 %v383_v40, %v422_v41 }
  0xb3   : > { %827 = vmatmul.msk.f32.gmra.mxu1 %vm458_vm1, %v438_v42 }
  0xb4   : > { %v385_v43 = vpop.f32.mrf.mxu0 }
  0xb5   : > { %v386_v44 = vadd.f32 %v1029_v22, %v385_v43 }
  0xb7   : > { %v423_v45 = vmul.f32 0.2, %v386_v44 }
  0xb9   : > { %v439_v46 = vmax.f32 %v386_v44, %v423_v45 }
  0xbb   : > { %828 = vmatmul.msk.f32.gmra.mxu1 %vm458_vm1, %v439_v46 }
  0xbc   : > { %v388_v47 = vpop.f32.mrf.mxu0 }
  0xbd   : > { %v389_v48 = vadd.f32 %v1029_v22, %v388_v47 }
  0xbf   : > { %v424_v49 = vmul.f32 0.2, %v389_v48 }
  0xc1   : > { %v440_v50 = vmax.f32 %v389_v48, %v424_v49 }
  0xc3   : > { %829 = vmatmul.msk.f32.gmra.mxu1 %vm458_vm1, %v440_v50 }
  0xc4   : > { %v391_v51 = vpop.f32.mrf.mxu0 }
  0xc5   : > { %v392_v52 = vadd.f32 %v1029_v22, %v391_v51 }
  0xc7   : > { %v425_v53 = vmul.f32 0.2, %v392_v52 }
  0xc9   : > { %v441_v54 = vmax.f32 %v392_v52, %v425_v53 }
  0xcb   : > { %830 = vmatmul.msk.f32.gmra.mxu1 %vm458_vm1, %v441_v54 }
  0xcc   : > { %v394_v55 = vpop.f32.mrf.mxu0 }
  0xcd   : > { %v395_v56 = vadd.f32 %v1029_v22, %v394_v55 }
  0xcf   : > { %v426_v57 = vmul.f32 0.2, %v395_v56 }
  0xd1   : > { %v442_v58 = vmax.f32 %v395_v56, %v426_v57 }
  0xd3   : > { %831 = vmatmul.msk.f32.gmra.mxu1 %vm458_vm1, %v442_v58 }
  0xd4   : > { %v397_v59 = vpop.f32.mrf.mxu0 }
  0xd5   : > { %v398_v60 = vadd.f32 %v1029_v22, %v397_v59 }
  0xd7   : > { %v427_v61 = vmul.f32 0.2, %v398_v60 }
  0xd9   : > { %v443_v62 = vmax.f32 %v398_v60, %v427_v61 }
  0xdb   : > { %832 = vmatmul.msk.f32.gmra.mxu1 %vm458_vm1, %v443_v62 }
  0xdc   : > { %v400_v63 = vpop.f32.mrf.mxu0 }
  0xdd   : > { %v401_v0 = vadd.f32 %v1029_v22, %v400_v63 }
  0xdf   : > { %v428_v1 = vmul.f32 0.2, %v401_v0 }
  0xe1   : > { %v444_v2 = vmax.f32 %v401_v0, %v428_v1 }
  0xe3   : > { %833 = vmatmul.msk.f32.gmra.mxu1 %vm458_vm1, %v444_v2 }
  0xe4   : > { %v403_v3 = vpop.f32.mrf.mxu0 }
  0xe5   : > { %v404_v4 = vadd.f32 %v1029_v22, %v403_v3 }
  0xe7   : > { %v429_v5 = vmul.f32 0.2, %v404_v4 }
  0xe9   : > { %v445_v6 = vmax.f32 %v404_v4, %v429_v5 }
  0xeb   : > { %834 = vmatmul.msk.f32.gmra.mxu1 %vm458_vm1, %v445_v6 }
  0xec   : > { %v406_v8 = vpop.f32.mrf.mxu0 }
  0xed   : > { %v407_v9 = vadd.f32 %v1029_v22, %v406_v8 }
  0xef   : > { %v430_v10 = vmul.f32 0.2, %v407_v9 }
  0xf1   : > { %v446_v11 = vmax.f32 %v407_v9, %v430_v10 }
  0xf3   : > { %835 = vmatmul.msk.f32.vlgmr.msrb.gmra.mxu3 %vm458_vm1, %v446_v11 }
  0xfb   : > { %836 = vmatmul.msk.f32.gmra.mxu3 %vm458_vm1, %v447_v19 }
 0x103   : > { %837 = vmatmul.msk.f32.gmra.mxu3 %vm458_vm1, %v448_v24 }
 0x10b   : > { %838 = vmatmul.msk.f32.gmra.mxu3 %vm458_vm1, %v449_v27 }
 0x110   : > { %v524_v29 = vpop.f32.mrf.mxu1 }
 0x111   : > { %v525_v30 = vadd.f32 %v1078_v28, %v524_v29 }
 0x113   : > { %878 = vtanh.f32 %v525_v30 }
 0x118   : > { %v527_v31 = vpop.f32.mrf.mxu1 }
 0x119   : > { %v879_v32 = vpop.eup %878  ;;  %v528_v33 = vadd.f32 %v1078_v28, %v527_v31 }
 0x11a   : > { %839 = vmatmul.msk.f32.vlgmr.msra.gmra.mxu2 %vm458_vm1, %v879_v32 }
 0x11b   : > { %880 = vtanh.f32 %v528_v33 }
 0x120   : > { %v530_v22 = vpop.f32.mrf.mxu1 }
 0x121   : > { %v881_v34 = vpop.eup %880  ;;  %v531_v35 = vadd.f32 %v1078_v28, %v530_v22 }
 0x122   : > { %840 = vmatmul.msk.f32.gmra.mxu2 %vm458_vm1, %v881_v34 }
 0x123   : > { %882 = vtanh.f32 %v531_v35 }
 0x128   : > { %v533_v36 = vpop.f32.mrf.mxu1 }
 0x129   : > { %v883_v37 = vpop.eup %882  ;;  %v534_v38 = vadd.f32 %v1078_v28, %v533_v36 }
 0x12a   : > { %841 = vmatmul.msk.f32.gmra.mxu2 %vm458_vm1, %v883_v37 }
 0x12b   : > { %884 = vtanh.f32 %v534_v38 }
 0x130   : > { %v536_v39 = vpop.f32.mrf.mxu1 }
 0x131   : > { %v885_v40 = vpop.eup %884  ;;  %v537_v41 = vadd.f32 %v1078_v28, %v536_v39 }
 0x132   : > { %842 = vmatmul.msk.f32.gmra.mxu2 %vm458_vm1, %v885_v40 }
 0x133   : > { %886 = vtanh.f32 %v537_v41 }
 0x138   : > { %v539_v42 = vpop.f32.mrf.mxu1 }
 0x139   : > { %v887_v43 = vpop.eup %886  ;;  %v540_v44 = vadd.f32 %v1078_v28, %v539_v42 }
 0x13a   : > { %843 = vmatmul.msk.f32.gmra.mxu2 %vm458_vm1, %v887_v43 }
 0x13b   : > { %888 = vtanh.f32 %v540_v44 }
 0x140   : > { %v542_v45 = vpop.f32.mrf.mxu1 }
 0x141   : > { %v889_v46 = vpop.eup %888  ;;  %v543_v47 = vadd.f32 %v1078_v28, %v542_v45 }
 0x142   : > { %844 = vmatmul.msk.f32.gmra.mxu2 %vm458_vm1, %v889_v46 }
 0x143   : > { %890 = vtanh.f32 %v543_v47 }
 0x148   : > { %v545_v48 = vpop.f32.mrf.mxu1 }
 0x149   : > { %v891_v49 = vpop.eup %890  ;;  %v546_v50 = vadd.f32 %v1078_v28, %v545_v48 }
 0x14a   : > { %845 = vmatmul.msk.f32.gmra.mxu2 %vm458_vm1, %v891_v49 }
 0x14b   : > { %892 = vtanh.f32 %v546_v50 }
 0x150   : > { %v548_v51 = vpop.f32.mrf.mxu1 }
 0x151   : > { %v893_v52 = vpop.eup %892  ;;  %v549_v53 = vadd.f32 %v1078_v28, %v548_v51 }
 0x152   : > { %846 = vmatmul.msk.f32.gmra.mxu2 %vm458_vm1, %v893_v52 }
 0x153   : > { %894 = vtanh.f32 %v549_v53 }
 0x158   : > { %v551_v54 = vpop.f32.mrf.mxu1 }
 0x159   : > { %v895_v55 = vpop.eup %894  ;;  %v552_v56 = vadd.f32 %v1078_v28, %v551_v54 }
 0x15a   : > { %847 = vmatmul.msk.f32.gmra.mxu2 %vm458_vm1, %v895_v55 }
 0x15b   : > { %896 = vtanh.f32 %v552_v56 }
 0x160   : > { %v554_v57 = vpop.f32.mrf.mxu1 }
 0x161   : > { %v897_v58 = vpop.eup %896  ;;  %v555_v59 = vadd.f32 %v1078_v28, %v554_v57 }
 0x162   : > { %848 = vmatmul.msk.f32.gmra.mxu2 %vm458_vm1, %v897_v58 }
 0x163   : > { %898 = vtanh.f32 %v555_v59 }
 0x168   : > { %v557_v60 = vpop.f32.mrf.mxu1 }
 0x169   : > { %v899_v61 = vpop.eup %898  ;;  %v558_v62 = vadd.f32 %v1078_v28, %v557_v60 }
 0x16a   : > { %849 = vmatmul.msk.f32.gmra.mxu2 %vm458_vm1, %v899_v61 }
 0x16b   : > { %900 = vtanh.f32 %v558_v62 }
 0x171   : > { %v901_v63 = vpop.eup %900 }
 0x172   : > { %850 = vmatmul.msk.f32.gmra.mxu2 %vm458_vm1, %v901_v63 }
 0x176   : > { %v560_v0 = vpop.f32.mrf.mxu3 }
 0x177   : > { %v561_v1 = vadd.f32 %v1078_v28, %v560_v0 }
 0x179   : > { %902 = vtanh.f32 %v561_v1 }
 0x17e   : > { %v563_v2 = vpop.f32.mrf.mxu3 }
 0x17f   : > { %v903_v3 = vpop.eup %902  ;;  %v564_v4 = vadd.f32 %v1078_v28, %v563_v2 }
 0x180   : > { %851 = vmatmul.msk.f32.vlgmr.msra.gmra.mxu3 %vm458_vm1, %v903_v3 }
 0x181   : > { %904 = vtanh.f32 %v564_v4 }
 0x186   : > { %v566_v5 = vpop.f32.mrf.mxu3 }
 0x187   : > { %v905_v6 = vpop.eup %904  ;;  %v567_v7 = vadd.f32 %v1078_v28, %v566_v5 }
 0x188   : > { %852 = vmatmul.msk.f32.gmra.mxu3 %vm458_vm1, %v905_v6 }
 0x189   : > { %906 = vtanh.f32 %v567_v7 }
 0x18e   : > { %v569_v8 = vpop.f32.mrf.mxu3 }
 0x18f   : > { %v907_v9 = vpop.eup %906  ;;  %v570_v10 = vadd.f32 %v1078_v28, %v569_v8 }
 0x190   : > { %853 = vmatmul.msk.f32.gmra.mxu3 %vm458_vm1, %v907_v9 }
 0x191   : > { %908 = vtanh.f32 %v570_v10 }
 0x197   : > { %v909_v11 = vpop.eup %908 }
 0x198   : > { %854 = vmatmul.msk.f32.gmra.mxu3 %vm458_vm1, %v909_v11 }
 0x19d   : > { %v661_v13 = vpop.f32.mrf.mxu2 }
 0x19e   : > { %v662_v14 = vadd.f32 %v1115_v12, %v661_v13 }
 0x1a0   : > { %v709_v15 = vmax.f32 %v662_v14, 0.0 }
 0x1a2   : > { %726 = vst.msk [vmem:[%s1123_s16] sm:$0xff] %vm725_vm2, %v709_v15 }
 0x1a5   : > { %v664_v16 = vpop.f32.mrf.mxu2 }
 0x1a6   : > { %v665_v17 = vadd.f32 %v1115_v12, %v664_v16 }
 0x1a8   : > { %v710_v18 = vmax.f32 %v665_v17, 0.0 }
 0x1aa   : > { %727 = vst.msk [vmem:[%s1123_s16 + $0x8] sm:$0xff] %vm725_vm2, %v710_v18 }
 0x1ad   : > { %v667_v19 = vpop.f32.mrf.mxu2 }
 0x1ae   : > { %v668_v20 = vadd.f32 %v1115_v12, %v667_v19 }
 0x1b0   : > { %v711_v21 = vmax.f32 %v668_v20, 0.0 }
 0x1b2   : > { %728 = vst.msk [vmem:[%s1123_s16 + $0x10] sm:$0xff] %vm725_vm2, %v711_v21 }
 0x1b5   : > { %v670_v23 = vpop.f32.mrf.mxu2 }
 0x1b6   : > { %v671_v24 = vadd.f32 %v1115_v12, %v670_v23 }
 0x1b8   : > { %v712_v25 = vmax.f32 %v671_v24, 0.0 }
 0x1ba   : > { %729 = vst.msk [vmem:[%s1123_s16 + $0x18] sm:$0xff] %vm725_vm2, %v712_v25 }
 0x1bd   : > { %v673_v26 = vpop.f32.mrf.mxu2 }
 0x1be   : > { %v674_v27 = vadd.f32 %v1115_v12, %v673_v26 }
 0x1c0   : > { %v713_v28 = vmax.f32 %v674_v27, 0.0 }
 0x1c2   : > { %730 = vst.msk [vmem:[%s1123_s16 + $0x20] sm:$0xff] %vm725_vm2, %v713_v28 }
 0x1c5   : > { %v676_v29 = vpop.f32.mrf.mxu2 }
 0x1c6   : > { %v677_v30 = vadd.f32 %v1115_v12, %v676_v29 }
 0x1c8   : > { %v714_v31 = vmax.f32 %v677_v30, 0.0 }
 0x1ca   : > { %731 = vst.msk [vmem:[%s1123_s16 + $0x28] sm:$0xff] %vm725_vm2, %v714_v31 }
 0x1cd   : > { %v679_v32 = vpop.f32.mrf.mxu2 }
 0x1ce   : > { %v680_v33 = vadd.f32 %v1115_v12, %v679_v32 }
 0x1d0   : > { %v715_v22 = vmax.f32 %v680_v33, 0.0 }
 0x1d2   : > { %732 = vst.msk [vmem:[%s1123_s16 + $0x30] sm:$0xff] %vm725_vm2, %v715_v22 }
 0x1d5   : > { %v682_v34 = vpop.f32.mrf.mxu2 }
 0x1d6   : > { %v683_v35 = vadd.f32 %v1115_v12, %v682_v34 }
 0x1d8   : > { %v716_v36 = vmax.f32 %v683_v35, 0.0 }
 0x1da   : > { %733 = vst.msk [vmem:[%s1123_s16 + $0x38] sm:$0xff] %vm725_vm2, %v716_v36 }
 0x1dd   : > { %v685_v37 = vpop.f32.mrf.mxu2 }
 0x1de   : > { %v686_v38 = vadd.f32 %v1115_v12, %v685_v37 }
 0x1e0   : > { %v717_v39 = vmax.f32 %v686_v38, 0.0 }
 0x1e2   : > { %734 = vst.msk [vmem:[%s1123_s16 + $0x40] sm:$0xff] %vm725_vm2, %v717_v39 }
 0x1e5   : > { %v688_v40 = vpop.f32.mrf.mxu2 }
 0x1e6   : > { %v689_v41 = vadd.f32 %v1115_v12, %v688_v40 }
 0x1e8   : > { %v718_v42 = vmax.f32 %v689_v41, 0.0 }
 0x1ea   : > { %735 = vst.msk [vmem:[%s1123_s16 + $0x48] sm:$0xff] %vm725_vm2, %v718_v42 }
 0x1ed   : > { %v691_v43 = vpop.f32.mrf.mxu2 }
 0x1ee   : > { %v692_v44 = vadd.f32 %v1115_v12, %v691_v43 }
 0x1f0   : > { %v719_v45 = vmax.f32 %v692_v44, 0.0 }
 0x1f2   : > { %736 = vst.msk [vmem:[%s1123_s16 + $0x50] sm:$0xff] %vm725_vm2, %v719_v45 }
 0x1f5   : > { %v694_v46 = vpop.f32.mrf.mxu2 }
 0x1f6   : > { %v695_v47 = vadd.f32 %v1115_v12, %v694_v46 }
 0x1f8   : > { %v720_v48 = vmax.f32 %v695_v47, 0.0 }
 0x1fa   : > { %737 = vst.msk [vmem:[%s1123_s16 + $0x58] sm:$0xff] %vm725_vm2, %v720_v48 }
 0x203   : > { %v697_v49 = vpop.f32.mrf.mxu3 }
 0x204   : > { %v698_v50 = vadd.f32 %v1115_v12, %v697_v49 }
 0x206   : > { %v721_v51 = vmax.f32 %v698_v50, 0.0 }
 0x208   : > { %738 = vst.msk [vmem:[%s1123_s16 + $0x60] sm:$0xff] %vm725_vm2, %v721_v51 }
 0x20b   : > { %v700_v52 = vpop.f32.mrf.mxu3 }
 0x20c   : > { %v701_v53 = vadd.f32 %v1115_v12, %v700_v52 }
 0x20e   : > { %v722_v54 = vmax.f32 %v701_v53, 0.0 }
 0x210   : > { %739 = vst.msk [vmem:[%s1123_s16 + $0x68] sm:$0xff] %vm725_vm2, %v722_v54 }
 0x213   : > { %v703_v55 = vpop.f32.mrf.mxu3 }
 0x214   : > { %v704_v56 = vadd.f32 %v1115_v12, %v703_v55 }
 0x216   : > { %v723_v57 = vmax.f32 %v704_v56, 0.0 }
 0x218   : > { %740 = vst.msk [vmem:[%s1123_s16 + $0x70] sm:$0xff] %vm725_vm2, %v723_v57 }
 0x21b   : > { %v706_v58 = vpop.f32.mrf.mxu3 }
 0x21c   : > { %v707_v59 = vadd.f32 %v1115_v12, %v706_v58 }
 0x21e   : > { %v724_v60 = vmax.f32 %v707_v59, 0.0 }
 0x220   : > { %741 = vst.msk [vmem:[%s1123_s16 + $0x78] sm:$0xff] %vm725_vm2, %v724_v60 }
 0x221 PF: > { %s17_s24 = sadd.s32 1, %s916_s24  }
 0x222   : > { %p14_p4 = scmp.ge.s32.totalorder %s17_s24, 4  }
 0x224   :  { %16 = sbr.rel (!%p14_p4) target bundleno = 1 (0x1), region = 78 }

</bundles_post_ra>
